<compile_context>
chip_gen: v6e
topology: v6e:2x2x1
jax: 0.10.0
libtpu: 0.0.40
codegen_flags: <defaults>
</compile_context>

<pallas_src>
import functools

import jax
import jax.numpy as jnp
from jax.experimental import pallas as pl
from jax.experimental.pallas import tpu as pltpu

HIDDEN = 128   # fixed by the module architecture
FUSED_N = 2 * HIDDEN  # fused [reg-L1 | discriminator] RHS width / output width


def _round_up(x, m):
    return ((x + m - 1) // m) * m


def _wadda_fused_kernel(x_ref,                 # (1, TB, in_dim)   branch input tile
                        wf1_ref, bf1_ref,      # (1, in_dim, 128), (1, 1, 128)  branch feature L1
                        wf2_ref, bf2_ref,      # (1, 128, 128),    (1, 1, 128)  branch feature L2
                        wa_ref, ba_ref,        # (128, 256), (1, 256)  [wr1 | wd] fused (shared)
                        wr2_ref, br2_ref,      # (128, 128), (1, 128)  wr2 zero-padded (shared)
                        out_ref):              # (1, TB, 256) fused lane-dense output
    x = x_ref[0].astype(jnp.float32)

    # Feature extractor (branch-specific weights selected by grid axis 0).
    h1 = jnp.dot(x, wf1_ref[0], preferred_element_type=jnp.float32) + bf1_ref[0]
    h1 = jnp.maximum(h1, 0.0)
    feat = jnp.dot(h1, wf2_ref[0], preferred_element_type=jnp.float32) + bf2_ref[0]
    feat = jnp.maximum(feat, 0.0)

    # Fused [regression L1 | discriminator]: one 128x256 RHS, one MXU stream.
    t = jnp.dot(feat, wa_ref[...], preferred_element_type=jnp.float32) + ba_ref[...]
    r1 = jnp.maximum(t[:, :HIDDEN], 0.0)       # regression hidden (Dropout == identity in eval)

    # Regression L2, zero-padded to 128 output lanes (lane-dense store).
    reg_pad = jnp.dot(r1, wr2_ref[...], preferred_element_type=jnp.float32) + br2_ref[...]

    # Fused output slab: lanes [0:128) = padded regression, lanes [128:256) hold
    # the discriminator block (column 128 is the real dom value).
    fused = jnp.concatenate([reg_pad, t[:, HIDDEN:]], axis=-1)
    out_ref[0] = fused.astype(out_ref.dtype)


@functools.partial(jax.jit, static_argnames=("block_batch",))
def wadda_forward(src_x, tgt_x, src_f_params, tgt_f_params, reg_params, disc_params,
                  *, block_batch=512):
    """Mirror of WADDA.forward: returns (src_reg, src_domain, tgt_reg, tgt_domain)."""
    wf1s, bf1s, wf2s, bf2s = src_f_params
    wf1t, bf1t, wf2t, bf2t = tgt_f_params
    wr1, br1, wr2, br2 = reg_params
    wd, bd = disc_params

    B, in_dim = src_x.shape
    assert tgt_x.shape == (B, in_dim)
    out_dim = wr2.shape[1]
    assert out_dim <= HIDDEN, "fused output packs regression into the first 128 lanes"

    # Batch padding / tiling: sublane multiple of 8, tile capped at 512 rows
    # (fits v7x's 64 MiB VMEM with plenty of headroom; fine on v5e/v6e too).
    b_pad = _round_up(max(B, 8), 8)
    tb = min(block_batch, b_pad)
    num_bt = pl.cdiv(b_pad, tb)
    b_pad = num_bt * tb

    def pad_rows(x):
        return jnp.pad(x.astype(jnp.float32), ((0, b_pad - B), (0, 0)))

    # Stack the two branches' inputs and feature-extractor params along axis 0.
    x2 = jnp.stack([pad_rows(src_x), pad_rows(tgt_x)], axis=0)          # [2, b_pad, in_dim]
    wf1 = jnp.stack([wf1s, wf1t], axis=0)                               # [2, in_dim, 128]
    bf1 = jnp.stack([bf1s, bf1t], axis=0)                               # [2, 1, 128]
    wf2 = jnp.stack([wf2s, wf2t], axis=0)                               # [2, 128, 128]
    bf2 = jnp.stack([bf2s, bf2t], axis=0)                               # [2, 1, 128]

    # Shared heads: fuse [regression L1 | discriminator] along N (padded to 256),
    # and zero-pad regression L2 to 128 output lanes.
    wa = jnp.zeros((HIDDEN, FUSED_N), jnp.float32)
    wa = wa.at[:, :HIDDEN].set(wr1).at[:, HIDDEN:HIDDEN + 1].set(wd)
    ba = jnp.zeros((1, FUSED_N), jnp.float32)
    ba = ba.at[:, :HIDDEN].set(br1).at[:, HIDDEN:HIDDEN + 1].set(bd)
    wr2p = jnp.zeros((HIDDEN, HIDDEN), jnp.float32).at[:, :out_dim].set(wr2)
    br2p = jnp.zeros((1, HIDDEN), jnp.float32).at[:, :out_dim].set(br2)

    grid = (2, num_bt)  # (branch, batch tile)

    in_specs = [
        pl.BlockSpec((1, tb, in_dim), lambda b, i: (b, i, 0)),            # x (per branch/tile)
        pl.BlockSpec((1, in_dim, HIDDEN), lambda b, i: (b, 0, 0)),        # wf1 (per branch)
        pl.BlockSpec((1, 1, HIDDEN), lambda b, i: (b, 0, 0)),             # bf1
        pl.BlockSpec((1, HIDDEN, HIDDEN), lambda b, i: (b, 0, 0)),        # wf2
        pl.BlockSpec((1, 1, HIDDEN), lambda b, i: (b, 0, 0)),             # bf2
        pl.BlockSpec((HIDDEN, FUSED_N), lambda b, i: (0, 0)),             # wa (shared, resident)
        pl.BlockSpec((1, FUSED_N), lambda b, i: (0, 0)),                  # ba
        pl.BlockSpec((HIDDEN, HIDDEN), lambda b, i: (0, 0)),              # wr2 padded
        pl.BlockSpec((1, HIDDEN), lambda b, i: (0, 0)),                   # br2 padded
    ]
    out_spec = pl.BlockSpec((1, tb, FUSED_N), lambda b, i: (b, i, 0))

    flops = 2 * b_pad * 2 * (in_dim * HIDDEN + HIDDEN * HIDDEN
                             + HIDDEN * FUSED_N + HIDDEN * HIDDEN)
    bytes_accessed = 4 * (2 * b_pad * in_dim                      # inputs
                          + 2 * (in_dim * HIDDEN + HIDDEN * HIDDEN + 2 * HIDDEN)  # branch weights
                          + HIDDEN * FUSED_N + FUSED_N + HIDDEN * HIDDEN + HIDDEN  # shared weights
                          + 2 * b_pad * FUSED_N)                  # fused output

    fused = pl.pallas_call(
        _wadda_fused_kernel,
        out_shape=jax.ShapeDtypeStruct((2, b_pad, FUSED_N), jnp.float32),
        grid=grid,
        in_specs=in_specs,
        out_specs=out_spec,
        compiler_params=pltpu.CompilerParams(
            dimension_semantics=("parallel", "parallel")),
        cost_estimate=pl.CostEstimate(
            flops=flops, transcendentals=0, bytes_accessed=bytes_accessed),
    )(x2, wf1, bf1, wf2, bf2, wa, ba, wr2p, br2p)

    src_reg = fused[0, :B, :out_dim]
    src_dom = fused[0, :B, HIDDEN:HIDDEN + 1]
    tgt_reg = fused[1, :B, :out_dim]
    tgt_dom = fused[1, :B, HIDDEN:HIDDEN + 1]
    return src_reg, src_dom, tgt_reg, tgt_dom


def _init_linear(key, in_dim, out_dim):
    kw, kb = jax.random.split(key)
    # Deterministic synthetic init (not a checkpoint load). Weight is [in, out].
    scale = 1.0 / jnp.sqrt(jnp.float32(in_dim))
    w = jax.random.uniform(kw, (in_dim, out_dim), jnp.float32, -scale, scale)
    b = jax.random.uniform(kb, (1, out_dim), jnp.float32, -scale, scale)
    return w, b


if __name__ == "__main__":
    key = jax.random.PRNGKey(0)
    batch = 8
    input_dim = 16
    output_dim = 8

    keys = jax.random.split(key, 10)

    # SRC_F: Linear(input_dim,128)+ReLU, Linear(128,128)+ReLU
    wf1s, bf1s = _init_linear(keys[0], input_dim, HIDDEN)
    wf2s, bf2s = _init_linear(keys[1], HIDDEN, HIDDEN)
    src_f_params = (wf1s, bf1s, wf2s, bf2s)

    # TGT_F: same shapes, different weights
    wf1t, bf1t = _init_linear(keys[2], input_dim, HIDDEN)
    wf2t, bf2t = _init_linear(keys[3], HIDDEN, HIDDEN)
    tgt_f_params = (wf1t, bf1t, wf2t, bf2t)

    # regression: Linear(128,128)+Dropout+ReLU, Linear(128,output_dim)
    wr1, br1 = _init_linear(keys[4], HIDDEN, HIDDEN)
    wr2, br2 = _init_linear(keys[5], HIDDEN, output_dim)
    reg_params = (wr1, br1, wr2, br2)

    # discriminator: Linear(128,1)
    wd, bd = _init_linear(keys[6], HIDDEN, 1)
    disc_params = (wd, bd)

    src_x = jax.random.normal(keys[7], (batch, input_dim), jnp.float32)
    tgt_x = jax.random.normal(keys[8], (batch, input_dim), jnp.float32)

    src_reg, src_dom, tgt_reg, tgt_dom = wadda_forward(
        src_x, tgt_x, src_f_params, tgt_f_params, reg_params, disc_params)
    jax.block_until_ready((src_reg, src_dom, tgt_reg, tgt_dom))

    # Pure-JAX reference check
    def ref_branch(x, fp, rp, dp):
        w1, b1, w2, b2 = fp
        w3, b3, w4, b4 = rp
        wd_, bd_ = dp
        h1 = jnp.maximum(x @ w1 + b1, 0.0)
        feat = jnp.maximum(h1 @ w2 + b2, 0.0)
        r1 = jnp.maximum(feat @ w3 + b3, 0.0)
        return r1 @ w4 + b4, feat @ wd_ + bd_

    ref_src_reg, ref_src_dom = ref_branch(src_x, src_f_params, reg_params, disc_params)
    ref_tgt_reg, ref_tgt_dom = ref_branch(tgt_x, tgt_f_params, reg_params, disc_params)

    assert src_reg.shape == (batch, output_dim) and src_dom.shape == (batch, 1)
    assert jnp.allclose(src_reg, ref_src_reg, atol=1e-4, rtol=1e-5)
    assert jnp.allclose(src_dom, ref_src_dom, atol=1e-4, rtol=1e-5)
    assert jnp.allclose(tgt_reg, ref_tgt_reg, atol=1e-4, rtol=1e-5)
    assert jnp.allclose(tgt_dom, ref_tgt_dom, atol=1e-4, rtol=1e-5)

    print("KERNEL_OK")
</pallas_src>

<mosaic_0001>
module attributes {stable_mosaic.version = 11 : i64} {
  func.func @_wadda_fused_kernel(%arg0: i32, %arg1: i32, %arg2: memref<1x8x16xf32, #tpu.memory_space<vmem>>, %arg3: memref<1x16x128xf32, #tpu.memory_space<vmem>>, %arg4: memref<1x1x128xf32, #tpu.memory_space<vmem>>, %arg5: memref<1x128x128xf32, #tpu.memory_space<vmem>>, %arg6: memref<1x1x128xf32, #tpu.memory_space<vmem>>, %arg7: memref<128x256xf32, #tpu.memory_space<vmem>>, %arg8: memref<1x256xf32, #tpu.memory_space<vmem>>, %arg9: memref<128x128xf32, #tpu.memory_space<vmem>>, %arg10: memref<1x128xf32, #tpu.memory_space<vmem>>, %arg11: memref<1x8x256xf32, #tpu.memory_space<vmem>>) attributes {dimension_semantics = [#tpu.dimension_semantics<parallel>, #tpu.dimension_semantics<parallel>], iteration_bounds = array<i64: 2, 1>, scalar_prefetch = 0 : i64, scratch_operands = 0 : i64, tpu.core_type = #tpu.core_type<tc>, window_params = [{transform_indices = @transform_0, window_bounds = array<i64: 1, 8, 16>}, {transform_indices = @transform_1, window_bounds = array<i64: 1, 16, 128>}, {transform_indices = @transform_2, window_bounds = array<i64: 1, 1, 128>}, {transform_indices = @transform_3, window_bounds = array<i64: 1, 128, 128>}, {transform_indices = @transform_4, window_bounds = array<i64: 1, 1, 128>}, {pipeline_mode = #tpu.pipeline_mode<synchronous>, transform_indices = @transform_5, window_bounds = array<i64: 128, 256>}, {pipeline_mode = #tpu.pipeline_mode<synchronous>, transform_indices = @transform_6, window_bounds = array<i64: 1, 256>}, {pipeline_mode = #tpu.pipeline_mode<synchronous>, transform_indices = @transform_7, window_bounds = array<i64: 128, 128>}, {pipeline_mode = #tpu.pipeline_mode<synchronous>, transform_indices = @transform_8, window_bounds = array<i64: 1, 128>}, {transform_indices = @transform_9, window_bounds = array<i64: 1, 8, 256>}]} {
    %c0 = arith.constant 0 : index
    %c0_0 = arith.constant 0 : index
    %c0_1 = arith.constant 0 : index
    %0 = vector.load %arg2[%c0, %c0_0, %c0_1] : memref<1x8x16xf32, #tpu.memory_space<vmem>>, vector<1x8x16xf32>
    %1 = vector.shape_cast %0 : vector<1x8x16xf32> to vector<8x16xf32>
    %c0_2 = arith.constant 0 : index
    %c0_3 = arith.constant 0 : index
    %c0_4 = arith.constant 0 : index
    %2 = vector.load %arg3[%c0_2, %c0_3, %c0_4] : memref<1x16x128xf32, #tpu.memory_space<vmem>>, vector<1x16x128xf32>
    %3 = vector.shape_cast %2 : vector<1x16x128xf32> to vector<16x128xf32>
    %cst = arith.constant dense<0.000000e+00> : vector<8x128xf32>
    %4 = tpu.matmul %1, %3, %cst {dimension_numbers = #tpu.dot_dimension_numbers<[1], [0], [0], [1], [0, 0, 1, 1], [], []>} : vector<8x16xf32>, vector<16x128xf32>, vector<8x128xf32> -> vector<8x128xf32>
    %c0_5 = arith.constant 0 : index
    %c0_6 = arith.constant 0 : index
    %c0_7 = arith.constant 0 : index
    %5 = vector.load %arg4[%c0_5, %c0_6, %c0_7] : memref<1x1x128xf32, #tpu.memory_space<vmem>>, vector<1x1x128xf32>
    %6 = vector.shape_cast %5 : vector<1x1x128xf32> to vector<1x128xf32>
    %7 = vector.broadcast %6 : vector<1x128xf32> to vector<8x128xf32>
    %8 = arith.addf %4, %7 : vector<8x128xf32>
    %cst_8 = arith.constant 0.000000e+00 : f32
    %9 = vector.broadcast %cst_8 : f32 to vector<8x128xf32>
    %10 = arith.maximumf %8, %9 : vector<8x128xf32>
    %c0_9 = arith.constant 0 : index
    %c0_10 = arith.constant 0 : index
    %c0_11 = arith.constant 0 : index
    %11 = vector.load %arg5[%c0_9, %c0_10, %c0_11] : memref<1x128x128xf32, #tpu.memory_space<vmem>>, vector<1x128x128xf32>
    %12 = vector.shape_cast %11 : vector<1x128x128xf32> to vector<128x128xf32>
    %cst_12 = arith.constant dense<0.000000e+00> : vector<8x128xf32>
    %13 = tpu.matmul %10, %12, %cst_12 {dimension_numbers = #tpu.dot_dimension_numbers<[1], [0], [0], [1], [0, 0, 1, 1], [], []>} : vector<8x128xf32>, vector<128x128xf32>, vector<8x128xf32> -> vector<8x128xf32>
    %c0_13 = arith.constant 0 : index
    %c0_14 = arith.constant 0 : index
    %c0_15 = arith.constant 0 : index
    %14 = vector.load %arg6[%c0_13, %c0_14, %c0_15] : memref<1x1x128xf32, #tpu.memory_space<vmem>>, vector<1x1x128xf32>
    %15 = vector.shape_cast %14 : vector<1x1x128xf32> to vector<1x128xf32>
    %16 = vector.broadcast %15 : vector<1x128xf32> to vector<8x128xf32>
    %17 = arith.addf %13, %16 : vector<8x128xf32>
    %cst_16 = arith.constant 0.000000e+00 : f32
    %18 = vector.broadcast %cst_16 : f32 to vector<8x128xf32>
    %19 = arith.maximumf %17, %18 : vector<8x128xf32>
    %c0_17 = arith.constant 0 : index
    %c0_18 = arith.constant 0 : index
    %20 = vector.load %arg7[%c0_17, %c0_18] : memref<128x256xf32, #tpu.memory_space<vmem>>, vector<128x256xf32>
    %cst_19 = arith.constant dense<0.000000e+00> : vector<8x256xf32>
    %21 = tpu.matmul %19, %20, %cst_19 {dimension_numbers = #tpu.dot_dimension_numbers<[1], [0], [0], [1], [0, 0, 1, 1], [], []>} : vector<8x128xf32>, vector<128x256xf32>, vector<8x256xf32> -> vector<8x256xf32>
    %c0_20 = arith.constant 0 : index
    %c0_21 = arith.constant 0 : index
    %22 = vector.load %arg8[%c0_20, %c0_21] : memref<1x256xf32, #tpu.memory_space<vmem>>, vector<1x256xf32>
    %23 = vector.broadcast %22 : vector<1x256xf32> to vector<8x256xf32>
    %24 = arith.addf %21, %23 : vector<8x256xf32>
    %25 = vector.extract_strided_slice %24 {offsets = [0, 0], sizes = [8, 128], strides = [1, 1]} : vector<8x256xf32> to vector<8x128xf32>
    %cst_22 = arith.constant 0.000000e+00 : f32
    %26 = vector.broadcast %cst_22 : f32 to vector<8x128xf32>
    %27 = arith.maximumf %25, %26 : vector<8x128xf32>
    %c0_23 = arith.constant 0 : index
    %c0_24 = arith.constant 0 : index
    %28 = vector.load %arg9[%c0_23, %c0_24] : memref<128x128xf32, #tpu.memory_space<vmem>>, vector<128x128xf32>
    %cst_25 = arith.constant dense<0.000000e+00> : vector<8x128xf32>
    %29 = tpu.matmul %27, %28, %cst_25 {dimension_numbers = #tpu.dot_dimension_numbers<[1], [0], [0], [1], [0, 0, 1, 1], [], []>} : vector<8x128xf32>, vector<128x128xf32>, vector<8x128xf32> -> vector<8x128xf32>
    %c0_26 = arith.constant 0 : index
    %c0_27 = arith.constant 0 : index
    %30 = vector.load %arg10[%c0_26, %c0_27] : memref<1x128xf32, #tpu.memory_space<vmem>>, vector<1x128xf32>
    %31 = vector.broadcast %30 : vector<1x128xf32> to vector<8x128xf32>
    %32 = arith.addf %29, %31 : vector<8x128xf32>
    %33 = vector.extract_strided_slice %24 {offsets = [0, 128], sizes = [8, 128], strides = [1, 1]} : vector<8x256xf32> to vector<8x128xf32>
    %34 = tpu.concatenate %32, %33 in 1 : vector<8x128xf32>, vector<8x128xf32> -> vector<8x256xf32>
    %c0_28 = arith.constant 0 : index
    %c0_29 = arith.constant 0 : index
    %c0_30 = arith.constant 0 : index
    %35 = vector.load %arg11[%c0_28, %c0_29, %c0_30] : memref<1x8x256xf32, #tpu.memory_space<vmem>>, vector<1x8x256xf32>
    %36 = vector.shape_cast %35 : vector<1x8x256xf32> to vector<8x256xf32>
    %37 = vector.shape_cast %34 : vector<8x256xf32> to vector<1x8x256xf32>
    tpu.vector_store %arg11[%c0_28, %c0_29, %c0_30], %37 {strides = array<i32>} : memref<1x8x256xf32, #tpu.memory_space<vmem>>, vector<1x8x256xf32>,
    return
  }
  func.func @transform_0(%arg0: i32, %arg1: i32) -> (i32, i32, i32) {
    %c0_i32 = arith.constant 0 : i32
    %c0_i32_0 = arith.constant 0 : i32
    return %arg0, %arg1, %c0_i32 : i32, i32, i32
  }
  func.func @transform_1(%arg0: i32, %arg1: i32) -> (i32, i32, i32) {
    %c0_i32 = arith.constant 0 : i32
    %c0_i32_0 = arith.constant 0 : i32
    %c0_i32_1 = arith.constant 0 : i32
    return %arg0, %c0_i32, %c0_i32_0 : i32, i32, i32
  }
  func.func @transform_2(%arg0: i32, %arg1: i32) -> (i32, i32, i32) {
    %c0_i32 = arith.constant 0 : i32
    %c0_i32_0 = arith.constant 0 : i32
    %c0_i32_1 = arith.constant 0 : i32
    return %arg0, %c0_i32, %c0_i32_0 : i32, i32, i32
  }
  func.func @transform_3(%arg0: i32, %arg1: i32) -> (i32, i32, i32) {
    %c0_i32 = arith.constant 0 : i32
    %c0_i32_0 = arith.constant 0 : i32
    %c0_i32_1 = arith.constant 0 : i32
    return %arg0, %c0_i32, %c0_i32_0 : i32, i32, i32
  }
  func.func @transform_4(%arg0: i32, %arg1: i32) -> (i32, i32, i32) {
    %c0_i32 = arith.constant 0 : i32
    %c0_i32_0 = arith.constant 0 : i32
    %c0_i32_1 = arith.constant 0 : i32
    return %arg0, %c0_i32, %c0_i32_0 : i32, i32, i32
  }
  func.func @transform_5(%arg0: i32, %arg1: i32) -> (i32, i32) {
    %c0_i32 = arith.constant 0 : i32
    %c0_i32_0 = arith.constant 0 : i32
    %c0_i32_1 = arith.constant 0 : i32
    return %c0_i32, %c0_i32_0 : i32, i32
  }
  func.func @transform_6(%arg0: i32, %arg1: i32) -> (i32, i32) {
    %c0_i32 = arith.constant 0 : i32
    %c0_i32_0 = arith.constant 0 : i32
    %c0_i32_1 = arith.constant 0 : i32
    return %c0_i32, %c0_i32_0 : i32, i32
  }
  func.func @transform_7(%arg0: i32, %arg1: i32) -> (i32, i32) {
    %c0_i32 = arith.constant 0 : i32
    %c0_i32_0 = arith.constant 0 : i32
    %c0_i32_1 = arith.constant 0 : i32
    return %c0_i32, %c0_i32_0 : i32, i32
  }
  func.func @transform_8(%arg0: i32, %arg1: i32) -> (i32, i32) {
    %c0_i32 = arith.constant 0 : i32
    %c0_i32_0 = arith.constant 0 : i32
    %c0_i32_1 = arith.constant 0 : i32
    return %c0_i32, %c0_i32_0 : i32, i32
  }
  func.func @transform_9(%arg0: i32, %arg1: i32) -> (i32, i32, i32) {
    %c0_i32 = arith.constant 0 : i32
    %c0_i32_0 = arith.constant 0 : i32
    return %arg0, %arg1, %c0_i32 : i32, i32, i32
  }
}

</mosaic_0001>

<bundles_post_ra>
// kernel: wadda_forward.1
= control target key start
LH: loop header
LB: loop body
LE: loop exit
PB: predicated region body
PF: predicated region fallthrough
CT: control target
= control target key end

     0   :  { %s1186_s30 = smov 0   ;;  %s1188_s10 = smov 0   ;;  %s1451_s0 = inlined_call_operand.vmem [shape: f32[2,8,16], index: 0, kind: input, shape index: {}]   ;;  %s1452_s1 = inlined_call_operand.vmem [shape: f32[2,16,128], index: 1, kind: input, shape index: {}]   ;;  %s1453_s2 = inlined_call_operand.vmem [shape: f32[2,1,128], index: 2, kind: input, shape index: {}]   ;;  %s1454_s3 = inlined_call_operand.vmem [shape: f32[2,128,128], index: 3, kind: input, shape index: {}]   ;;  %s1455_s4 = inlined_call_operand.vmem [shape: f32[2,1,128], index: 4, kind: input, shape index: {}]   ;;  %s1456_s5 = inlined_call_operand.vmem [shape: f32[128,256], index: 5, kind: input, shape index: {}]   ;;  %s1457_s6 = inlined_call_operand.vmem [shape: f32[1,256], index: 6, kind: input, shape index: {}]   ;;  %s1458_s7 = inlined_call_operand.vmem [shape: f32[128,128], index: 7, kind: input, shape index: {}]   ;;  %s1459_s8 = inlined_call_operand.vmem [shape: f32[1,128], index: 8, kind: input, shape index: {}]   ;;  %s1460_s9 = inlined_call_operand.vmem [shape: f32[2,8,256], index: 9, kind: output, shape index: {}]  }
   0x1   :  { %s1190_s11 = smov 0  }
   0x2 LB: > { %s31_s12 = sadd.s32 1, %s1128_s10  ;;  %p953_p0 = scmp.ge.s32.totalorder %s1132_s11, 1  ;;  %s1132_s11 = sphi %s1190_s11, %s19_s11   ;;  %s1128_s10 = sphi %s1188_s10, %s1462_s10   ;;  %s1124_s30 = sphi %s1186_s30, %s1461_s30  }
   0x3   : > { %p33_p1 = scmp.ge.s32.totalorder %s31_s12, 2  ;;  %p341_p2 = scmp.lt.s32.totalorder %s1132_s11, 3 }
   0x5   : > { %s1464_s12 = smov (%p33_p1, %s31_s12), 0  ;;  %p342_p3 = pnand %p953_p0, %p341_p2 }
   0x6   : > { %p399_p4 = scmp.lt.s32.totalorder (!%p342_p3), %s1124_s30, 1 }
   0x7   : > { %345 = sbr.rel (%p342_p3) target bundleno = 806 (0x326), region = 56 }
   0xc   : > { %v1134_v0 = vmov 0.0   ;;  %vm1135_vm0 = vmmov 0   ;;  %s1466_s30 = smov (!%p399_p4, %s1124_s30), 1  ;;  %vm441_vm1 = vcmask 130048   ;;  %v641_v20 = vld [vmem:[%s1456_s5 + $0xf8] sm:$0xff]  ;;  %v640_v21 = vld [vmem:[%s1456_s5 + $0xf0] sm:$0xff] }
   0xd   : > { %1007 = vmatprep.subr.mxu0 %v1134_v0  ;;  %1011 = vmatprep.mubr.msk.f32.mxu0 %vm1135_vm0, %v1134_v0  ;;  %s967_s13 = sshll.u32 %s1466_s30, 4  ;;  %s968_s14 = sshll.u32 %s1466_s30, 7  ;;  %v639_v22 = vld [vmem:[%s1456_s5 + $0xe8] sm:$0xff]  ;;  %v638_v23 = vld [vmem:[%s1456_s5 + $0xe0] sm:$0xff]  ;;  %v637_v24 = vld [vmem:[%s1456_s5 + $0xd8] sm:$0xff] }
   0xe   : > { %1014 = vmatprep.subr.mxu1 %v1134_v0  ;;  %1046 = vmatprep.mubr.msk.f32.mxu1 %vm1135_vm0, %v1134_v0  ;;  %s410_s17 = scalar_lea.vmem %s1452_s1, %s967_s13  ;;  %s1222_s20 = scalar_lea.vmem %s1454_s3, %s968_s14  ;;  %v636_v25 = vld [vmem:[%s1456_s5 + $0xd0] sm:$0xff]  ;;  %v635_v26 = vld [vmem:[%s1456_s5 + $0xc8] sm:$0xff]  ;;  %v634_v27 = vld [vmem:[%s1456_s5 + $0xc0] sm:$0xff] }
   0xf   : > { %v433_v1 = vld [vmem:[%s410_s17 + $0x8] sm:$0xff]  ;;  %v432_v2 = vld [vmem:[%s410_s17] sm:$0xff]  ;;  %s954_s21 = sshll.u32 %s1466_s30, 3  ;;  %v531_v3 = vld [vmem:[%s1222_s20 + $0x78] sm:$0xff]  ;;  %s413_s17 = scalar_lea.vmem %s1453_s2, %s1466_s30 }
  0x10   : > { %1008 = vmatpush3.msra.mxu0 %v433_v1  ;;  %s405_s24 = scalar_lea.vmem %s1451_s0, %s954_s21  ;;  %1015 = vmatpush3.msra.mxu1 %v531_v3  ;;  %v530_v4 = vld [vmem:[%s1222_s20 + $0x70] sm:$0xff]  ;;  %v529_v6 = vld [vmem:[%s1222_s20 + $0x68] sm:$0xff]  ;;  %v528_v7 = vld [vmem:[%s1222_s20 + $0x60] sm:$0xff]  ;;  %s430_s19 = scalar_lea.vmem %s1460_s9, %s967_s13 }
  0x11   : > { %1009 = vmatprep.subr.mxu0 %v1134_v0  ;;  %v431_v5 = vld [vmem:[%s405_s24] sm:$0xff]  ;;  %1016 = vmatprep.subr.mxu1 %v1134_v0  ;;  %v527_v8 = vld [vmem:[%s1222_s20 + $0x58] sm:$0xff]  ;;  %v526_v9 = vld [vmem:[%s1222_s20 + $0x50] sm:$0xff]  ;;  %s421_s24 = scalar_lea.vmem %s1455_s4, %s1466_s30 }
  0x12   : > { %1010 = vmatpush3.msra.mxu0 %v432_v2  ;;  %1017 = vmatpush3.msra.mxu1 %v530_v4  ;;  %v525_v10 = vld [vmem:[%s1222_s20 + $0x48] sm:$0xff]  ;;  %v524_v11 = vld [vmem:[%s1222_s20 + $0x40] sm:$0xff]  ;;  %v523_v12 = vld [vmem:[%s1222_s20 + $0x38] sm:$0xff] }
  0x13   : > { %1012 = vmatmul.mubr.msk.f32.vlgmr.msra.gmra.mxu0 %vm441_vm1, %v431_v5  ;;  %1018 = vmatprep.subr.mxu1 %v1134_v0  ;;  %v522_v13 = vld [vmem:[%s1222_s20 + $0x30] sm:$0xff]  ;;  %v521_v14 = vld [vmem:[%s1222_s20 + $0x28] sm:$0xff]  ;;  %v520_v15 = vld [vmem:[%s1222_s20 + $0x20] sm:$0xff] }
  0x14   : > { %1019 = vmatpush3.msra.mxu1 %v529_v6  ;;  %718 = vmatprep.mubr.f32.mxu0 %v1134_v0  ;;  %v519_v16 = vld [vmem:[%s1222_s20 + $0x18] sm:$0xff]  ;;  %v518_v17 = vld [vmem:[%s1222_s20 + $0x10] sm:$0xff]  ;;  %v517_v18 = vld [vmem:[%s1222_s20 + $0x8] sm:$0xff] }
  0x15   : > { %1020 = vmatprep.subr.mxu1 %v1134_v0  ;;  %v516_v19 = vld [vmem:[%s1222_s20] sm:$0xff]  ;;  %654 = vmatprep.subr.mxu0 %v641_v20  ;;  %v633_v28 = vld [vmem:[%s1456_s5 + $0xb8] sm:$0xff]  ;;  %v632_v29 = vld [vmem:[%s1456_s5 + $0xb0] sm:$0xff] }
  0x16   : > { %1021 = vmatpush3.msra.mxu1 %v528_v7  ;;  %655 = vmatpush1.msra.mxu0 %v640_v21  ;;  %v631_v30 = vld [vmem:[%s1456_s5 + $0xa8] sm:$0xff]  ;;  %v630_v31 = vld [vmem:[%s1456_s5 + $0xa0] sm:$0xff]  ;;  %v629_v32 = vld [vmem:[%s1456_s5 + $0x98] sm:$0xff] }
  0x17   : > { %1022 = vmatprep.subr.mxu1 %v1134_v0  ;;  %656 = vmatprep.subr.mxu0 %v639_v22  ;;  %v628_v33 = vld [vmem:[%s1456_s5 + $0x90] sm:$0xff]  ;;  %v627_v34 = vld [vmem:[%s1456_s5 + $0x88] sm:$0xff]  ;;  %v626_v35 = vld [vmem:[%s1456_s5 + $0x80] sm:$0xff] }
  0x18   : > { %1023 = vmatpush3.msra.mxu1 %v527_v8  ;;  %657 = vmatpush1.msra.mxu0 %v638_v23  ;;  %v625_v36 = vld [vmem:[%s1456_s5 + $0x78] sm:$0xff]  ;;  %v624_v37 = vld [vmem:[%s1456_s5 + $0x70] sm:$0xff]  ;;  %v623_v38 = vld [vmem:[%s1456_s5 + $0x68] sm:$0xff] }
  0x19   : > { %1024 = vmatprep.subr.mxu1 %v1134_v0  ;;  %658 = vmatprep.subr.mxu0 %v637_v24  ;;  %v622_v39 = vld [vmem:[%s1456_s5 + $0x60] sm:$0xff]  ;;  %v621_v40 = vld [vmem:[%s1456_s5 + $0x58] sm:$0xff]  ;;  %v620_v41 = vld [vmem:[%s1456_s5 + $0x50] sm:$0xff] }
  0x1a   : > { %1025 = vmatpush3.msra.mxu1 %v526_v9  ;;  %659 = vmatpush1.msra.mxu0 %v636_v25  ;;  %v619_v42 = vld [vmem:[%s1456_s5 + $0x48] sm:$0xff]  ;;  %v618_v43 = vld [vmem:[%s1456_s5 + $0x40] sm:$0xff]  ;;  %v617_v44 = vld [vmem:[%s1456_s5 + $0x38] sm:$0xff] }
  0x1b   : > { %1026 = vmatprep.subr.mxu1 %v1134_v0  ;;  %660 = vmatprep.subr.mxu0 %v635_v26  ;;  %v616_v45 = vld [vmem:[%s1456_s5 + $0x30] sm:$0xff]  ;;  %v615_v46 = vld [vmem:[%s1456_s5 + $0x28] sm:$0xff]  ;;  %v961_v47 = vld [vmem:[%s413_s17] ss:$0 sm:$0xff] }
  0x1c   : > { %1027 = vmatpush3.msra.mxu1 %v525_v10  ;;  %661 = vmatpush1.msra.mxu0 %v634_v27  ;;  %v614_v52 = vld [vmem:[%s1456_s5 + $0x20] sm:$0xff]  ;;  %v613_v53 = vld [vmem:[%s1456_s5 + $0x18] sm:$0xff]  ;;  %v612_v54 = vld [vmem:[%s1456_s5 + $0x10] sm:$0xff] }
  0x1d   : > { %1028 = vmatprep.subr.mxu1 %v1134_v0  ;;  %662 = vmatprep.subr.mxu0 %v633_v28  ;;  %v611_v55 = vld [vmem:[%s1456_s5 + $0x8] sm:$0xff]  ;;  %v610_v56 = vld [vmem:[%s1456_s5] sm:$0xff]  ;;  %v741_v57 = vld [vmem:[%s1458_s7 + $0x78] sm:$0xff] }
  0x1e   : > { %1029 = vmatpush3.msra.mxu1 %v524_v11  ;;  %663 = vmatpush1.msra.mxu0 %v632_v29  ;;  %v740_v58 = vld [vmem:[%s1458_s7 + $0x70] sm:$0xff]  ;;  %v739_v59 = vld [vmem:[%s1458_s7 + $0x68] sm:$0xff]  ;;  %v738_v60 = vld [vmem:[%s1458_s7 + $0x60] sm:$0xff] }
  0x1f   : > { %1030 = vmatprep.subr.mxu1 %v1134_v0  ;;  %664 = vmatprep.subr.mxu0 %v631_v30  ;;  %v737_v61 = vld [vmem:[%s1458_s7 + $0x58] sm:$0xff]  ;;  %v736_v62 = vld [vmem:[%s1458_s7 + $0x50] sm:$0xff]  ;;  %v735_v63 = vld [vmem:[%s1458_s7 + $0x48] sm:$0xff] }
  0x20   : > { %1031 = vmatpush3.msra.mxu1 %v523_v12  ;;  %665 = vmatpush1.msra.mxu0 %v630_v31  ;;  %v734_v1 = vld [vmem:[%s1458_s7 + $0x40] sm:$0xff]  ;;  %v733_v2 = vld [vmem:[%s1458_s7 + $0x38] sm:$0xff]  ;;  %v732_v3 = vld [vmem:[%s1458_s7 + $0x30] sm:$0xff] }
  0x21   : > { %1032 = vmatprep.subr.mxu1 %v1134_v0  ;;  %666 = vmatprep.subr.mxu0 %v629_v32  ;;  %v731_v4 = vld [vmem:[%s1458_s7 + $0x28] sm:$0xff]  ;;  %v730_v5 = vld [vmem:[%s1458_s7 + $0x20] sm:$0xff]  ;;  %v729_v6 = vld [vmem:[%s1458_s7 + $0x18] sm:$0xff] }
  0x22   : > { %1033 = vmatpush3.msra.mxu1 %v522_v13  ;;  %667 = vmatpush1.msra.mxu0 %v628_v33  ;;  %v963_v7 = vld [vmem:[%s421_s24] ss:$0 sm:$0xff]  ;;  %v728_v12 = vld [vmem:[%s1458_s7 + $0x10] sm:$0xff]  ;;  %v727_v13 = vld [vmem:[%s1458_s7 + $0x8] sm:$0xff] }
  0x23   : > { %1034 = vmatprep.subr.mxu1 %v1134_v0  ;;  %668 = vmatprep.subr.mxu0 %v627_v34  ;;  %v964_v26 = vld [vmem:[%s1459_s8] ss:$0 sm:$0xff] }
  0x24   : > { %1035 = vmatpush3.msra.mxu1 %v521_v14  ;;  %669 = vmatpush1.msra.mxu0 %v626_v35  ;;  %v726_v14 = vld [vmem:[%s1458_s7] sm:$0xff] }
  0x25   : > { %1036 = vmatprep.subr.mxu1 %v1134_v0  ;;  %670 = vmatprep.subr.mxu0 %v625_v36 }
  0x26   : > { %1037 = vmatpush3.msra.mxu1 %v520_v15  ;;  %671 = vmatpush1.msra.mxu0 %v624_v37  ;;  %v644_v15 = vlaneseq }
  0x27   : > { %1038 = vmatprep.subr.mxu1 %v1134_v0  ;;  %672 = vmatprep.subr.mxu0 %v623_v38 }
  0x28   : > { %1039 = vmatpush3.msra.mxu1 %v519_v16  ;;  %673 = vmatpush1.msra.mxu0 %v622_v39  ;;  %v645_v16 = vshrl.u32 %v644_v15, 7 }
  0x29   : > { %1040 = vmatprep.subr.mxu1 %v1134_v0  ;;  %674 = vmatprep.subr.mxu0 %v621_v40 }
  0x2a   : > { %1041 = vmatpush3.msra.mxu1 %v518_v17  ;;  %675 = vmatpush1.msra.mxu0 %v620_v41  ;;  %v646_v17 = vsub.s32 0, %v645_v16 }
  0x2b   : > { %1042 = vmatprep.subr.mxu1 %v1134_v0  ;;  %676 = vmatprep.subr.mxu0 %v619_v42 }
  0x2c   : > { %1043 = vmatpush3.msra.mxu1 %v517_v18  ;;  %677 = vmatpush1.msra.mxu0 %v618_v43  ;;  %v642_v18 = vld [vmem:[%s1457_s6] sm:$0x3] }
  0x2d   : > { %1044 = vmatprep.subr.mxu1 %v1134_v0  ;;  %678 = vmatprep.subr.mxu0 %v617_v44  ;;  %v647_v20 = vrot.slane %v642_v18, %v646_v17 }
  0x2e   : > { %1045 = vmatpush3.msra.mxu1 %v516_v19  ;;  %679 = vmatpush1.msra.mxu0 %v616_v45  ;;  %v650_v19 = vsub.s32 1, %v645_v16 }
  0x2f   : > { %1049 = vmatprep.subr.mxu1 %v1134_v0  ;;  %680 = vmatprep.subr.mxu0 %v615_v46 }
  0x30   : > { %681 = vmatpush1.msra.mxu0 %v614_v52  ;;  %v651_v21 = vrot.slane %v642_v18, %v650_v19 }
  0x31   : > { %682 = vmatprep.subr.mxu0 %v613_v53 }
  0x32   : > { %683 = vmatpush1.msra.mxu0 %v612_v54 }
  0x33   : > { %684 = vmatprep.subr.mxu0 %v611_v55 }
  0x34   : > { %685 = vmatpush1.msra.mxu0 %v610_v56 }
  0xd3   : > { %v511_v48 = vpop.f32.mrf.mxu0 }
  0xd4   : > { %v512_v49 = vadd.f32 %v961_v47, %v511_v48 }
  0xd5   : > { %v1013_v50 = vpop.f32.mrf.mxu0 }
  0xd6   : > { %v515_v51 = vmax.f32 %v512_v49, 0.0 }
  0xd8   : > { %1047 = vmatmul.mubr.f32.vlgmr.msra.gmra.mxu1 %v515_v51 }
  0xd9   : > { %1081 = vmatprep.mubr.msk.f32.mxu1 %vm1135_vm0, %v1134_v0  ;;  %1050 = vmatpush3.msra.mxu1 %v741_v57 }
  0xda   : > { %1051 = vmatprep.subr.mxu1 %v1134_v0 }
  0xdb   : > { %1052 = vmatpush3.msra.mxu1 %v740_v58 }
  0xdc   : > { %1053 = vmatprep.subr.mxu1 %v1134_v0 }
  0xdd   : > { %1054 = vmatpush3.msra.mxu1 %v739_v59 }
  0xde   : > { %1055 = vmatprep.subr.mxu1 %v1134_v0 }
  0xdf   : > { %1056 = vmatpush3.msra.mxu1 %v738_v60 }
  0xe0   : > { %1057 = vmatprep.subr.mxu1 %v1134_v0 }
  0xe1   : > { %1058 = vmatpush3.msra.mxu1 %v737_v61 }
  0xe2   : > { %1059 = vmatprep.subr.mxu1 %v1134_v0 }
  0xe3   : > { %1060 = vmatpush3.msra.mxu1 %v736_v62 }
  0xe4   : > { %1061 = vmatprep.subr.mxu1 %v1134_v0 }
  0xe5   : > { %1062 = vmatpush3.msra.mxu1 %v735_v63 }
  0xe6   : > { %1063 = vmatprep.subr.mxu1 %v1134_v0 }
  0xe7   : > { %1064 = vmatpush3.msra.mxu1 %v734_v1 }
  0xe8   : > { %1065 = vmatprep.subr.mxu1 %v1134_v0 }
  0xe9   : > { %1066 = vmatpush3.msra.mxu1 %v733_v2 }
  0xea   : > { %1067 = vmatprep.subr.mxu1 %v1134_v0 }
  0xeb   : > { %1068 = vmatpush3.msra.mxu1 %v732_v3 }
  0xec   : > { %1069 = vmatprep.subr.mxu1 %v1134_v0 }
  0xed   : > { %1070 = vmatpush3.msra.mxu1 %v731_v4 }
  0xee   : > { %1071 = vmatprep.subr.mxu1 %v1134_v0 }
  0xef   : > { %1072 = vmatpush3.msra.mxu1 %v730_v5 }
  0xf0   : > { %1073 = vmatprep.subr.mxu1 %v1134_v0 }
  0xf1   : > { %1074 = vmatpush3.msra.mxu1 %v729_v6 }
  0xf2   : > { %1075 = vmatprep.subr.mxu1 %v1134_v0 }
  0xf3   : > { %1076 = vmatpush3.msra.mxu1 %v728_v12 }
  0xf4   : > { %1077 = vmatprep.subr.mxu1 %v1134_v0 }
  0xf5   : > { %1078 = vmatpush3.msra.mxu1 %v727_v13 }
  0xf6   : > { %1079 = vmatprep.subr.mxu1 %v1134_v0 }
  0xf7   : > { %1080 = vmatpush3.msra.mxu1 %v726_v14 }
 0x198   : > { %v605_v8 = vpop.f32.mrf.mxu1 }
 0x199   : > { %v606_v9 = vadd.f32 %v963_v7, %v605_v8 }
 0x19a   : > { %v1048_v10 = vpop.f32.mrf.mxu1 }
 0x19b   : > { %v609_v11 = vmax.f32 %v606_v9, 0.0 }
 0x19d   : > { %719 = vmatmul.mubr.f32.vlgmr.msra.gmra.mxu0 %v609_v11 }
 0x25d   : > { %v720_v22 = vpop.f32.mrf.mxu0 }
 0x25e   : > { %v721_v23 = vadd.f32 %v720_v22, %v647_v20 }
 0x25f   : > { %v722_v0 = vpop.f32.mrf.mxu0 }
 0x260   : > { %v725_v24 = vmax.f32 %v721_v23, 0.0  ;;  %v723_v25 = vadd.f32 %v722_v0, %v651_v21 }
 0x262   : > { %820 = vst [vmem:[%s430_s19 + $0x8] sm:$0xff] %v723_v25  ;;  %1082 = vmatmul.mubr.f32.vlgmr.msra.gmra.mxu1 %v725_v24 }
 0x322   : > { %v815_v27 = vpop.f32.mrf.mxu1 }
 0x323   : > { %v816_v28 = vadd.f32 %v964_v26, %v815_v27 }
 0x324   : > { %v1083_v29 = vpop.f32.mrf.mxu1 }
 0x325   : > { %819 = vst [vmem:[%s430_s19] sm:$0xff] %v816_v28 }
 0x326 PF: > { %s19_s11 = sadd.s32 1, %s1132_s11   ;;  %s1461_s30 = smov %s1128_s10 }
 0x327   : > { %p16_p5 = scmp.ge.s32.totalorder %s19_s11, 4   ;;  %s1462_s10 = smov %s1464_s12 }
 0x329   :  { %18 = sbr.rel (!%p16_p5) target bundleno = 2 (0x2), region = 98 }

</bundles_post_ra>
